<compile_context>
chip_gen: v7x
topology: tpu7x:2x2x1
jax: 0.10.0
libtpu: 0.0.40
codegen_flags: <defaults>
</compile_context>

<pallas_src>
import jax
import jax.numpy as jnp
from jax.experimental import pallas as pl
from jax.experimental.pallas import tpu as pltpu

IN_FEATURES = 28 * 28          # 784
H1 = 20
H2 = 10
NUM_CLASSES = 10
LANE = 128                     # TPU lane width; narrow feature dims padded to this
H1_PAD = LANE
H2_PAD = LANE
OUT_PAD = LANE


def mlp_kernel(x_ref, w1_ref, w2_ref, w3_ref, o_ref):
    # x arrives as f32 (no wrapper-side convert pass); cast to bf16 in-VMEM for
    # the MXU. All matmuls accumulate in f32; ReLU / log-softmax stay f32.
    x = x_ref[...].astype(jnp.bfloat16)

    # fc1 + relu
    h1 = jnp.dot(x, w1_ref[...], preferred_element_type=jnp.float32)
    h1 = jnp.maximum(h1, 0.0).astype(jnp.bfloat16)
    # fc2 + relu
    h2 = jnp.dot(h1, w2_ref[...], preferred_element_type=jnp.float32)
    h2 = jnp.maximum(h2, 0.0).astype(jnp.bfloat16)
    # fc3
    logits = jnp.dot(h2, w3_ref[...], preferred_element_type=jnp.float32)

    # Logits slab is lane-padded to 128 columns; mask the padding to -inf so it
    # contributes nothing to the log-softmax reduction.
    col = jax.lax.broadcasted_iota(jnp.int32, logits.shape, 1)
    logits = jnp.where(col < NUM_CLASSES, logits, -jnp.inf)

    m = jnp.max(logits, axis=1, keepdims=True)
    shifted = logits - m
    lse = jnp.log(jnp.sum(jnp.exp(shifted), axis=1, keepdims=True))
    o_ref[...] = (shifted - lse).astype(o_ref.dtype)


def _choose_tile(batch, tb):
    """Pick the batch tile: big enough to amortize per-step overhead, small
    enough for v5e VMEM and to give the v7x megacore >= ~8 grid steps."""
    tb = min(tb, 1024)                      # v5e scoped-VMEM cap (f32 x tiles)
    tb = min(tb, max(8, pl.cdiv(batch, 8))) # >= ~8 steps when batch permits
    return max(8, -(-tb // 8) * 8)          # sublane multiple (8 for f32)


def pad_params(w1_t, w2_t, w3_t):
    """One-time prep: zero-pad narrow feature dims to 128 lanes and cast the
    weights to bf16 (MXU operands). Hoisted out of the per-call forward."""
    assert w1_t.shape == (IN_FEATURES, H1)
    assert w2_t.shape == (H1, H2)
    assert w3_t.shape == (H2, NUM_CLASSES)
    w1p = jnp.pad(w1_t, ((0, 0), (0, H1_PAD - H1))).astype(jnp.bfloat16)
    w2p = jnp.pad(w2_t, ((0, H1_PAD - H1), (0, H2_PAD - H2))).astype(jnp.bfloat16)
    w3p = jnp.pad(w3_t, ((0, H2_PAD - H2), (0, OUT_PAD - NUM_CLASSES))).astype(jnp.bfloat16)
    return w1p, w2p, w3p


def mlp_forward(x, w1p, w2p, w3p, *, tb=512):
    """x: (B, 784) f32; w*p: pre-padded bf16 weights (from pad_params).
    Returns (B, 10) f32 log-probs."""
    B = x.shape[0]
    assert x.shape[1] == IN_FEATURES
    assert w1p.shape == (IN_FEATURES, H1_PAD)
    assert w2p.shape == (H1_PAD, H2_PAD)
    assert w3p.shape == (H2_PAD, OUT_PAD)

    tb_eff = _choose_tile(B, tb)
    grid = (pl.cdiv(B, tb_eff),)
    Bp = grid[0] * tb_eff

    flops = 2 * Bp * (IN_FEATURES * H1_PAD + H1_PAD * H2_PAD + H2_PAD * OUT_PAD)
    bytes_accessed = (
        Bp * IN_FEATURES * 4                      # f32 x read
        + (w1p.size + w2p.size + w3p.size) * 2    # bf16 weights
        + Bp * OUT_PAD * 4                        # f32 padded log-prob write
    )
    cost = pl.CostEstimate(
        flops=flops,
        transcendentals=Bp * (OUT_PAD + 1),       # exp per lane + log per row
        bytes_accessed=bytes_accessed,
    )

    out = pl.pallas_call(
        mlp_kernel,
        out_shape=jax.ShapeDtypeStruct((B, OUT_PAD), jnp.float32),
        grid=grid,
        in_specs=[
            # x: tiled along batch (f32, cast in-kernel) -> pipelined DMAs.
            pl.BlockSpec((tb_eff, IN_FEATURES), lambda i: (i, 0)),
            # Weights: same block every grid step -> stay VMEM-resident.
            pl.BlockSpec((IN_FEATURES, H1_PAD), lambda i: (0, 0)),
            pl.BlockSpec((H1_PAD, H2_PAD), lambda i: (0, 0)),
            pl.BlockSpec((H2_PAD, OUT_PAD), lambda i: (0, 0)),
        ],
        out_specs=pl.BlockSpec((tb_eff, OUT_PAD), lambda i: (i, 0)),
        compiler_params=pltpu.CompilerParams(
            dimension_semantics=("parallel",),    # megacore sharding on v7x
        ),
        cost_estimate=cost,
    )(x, w1p, w2p, w3p)

    # Drop the 118 padded class lanes (batch is never padded: Pallas handles
    # a partial final block when tb does not divide B).
    return out[:, :NUM_CLASSES]


def init_params(key):
    """nn.Linear(bias=False) default init, uniform +/- 1/sqrt(fan_in), stored (in, out)."""
    k1, k2, k3 = jax.random.split(key, 3)

    def linear_w(k, fan_in, fan_out):
        bound = 1.0 / jnp.sqrt(fan_in)
        return jax.random.uniform(
            k, (fan_in, fan_out), dtype=jnp.float32, minval=-bound, maxval=bound
        )

    w1_t = linear_w(k1, IN_FEATURES, H1)
    w2_t = linear_w(k2, H1, H2)
    w3_t = linear_w(k3, H2, NUM_CLASSES)
    return w1_t, w2_t, w3_t


def reference_forward(x, w1_t, w2_t, w3_t):
    """Pure-JAX reference using the identical bf16-operand / f32-accumulation
    recipe as the kernel (x cast to bf16 right before fc1)."""
    xb = x.astype(jnp.bfloat16)
    w1b = w1_t.astype(jnp.bfloat16)
    w2b = w2_t.astype(jnp.bfloat16)
    w3b = w3_t.astype(jnp.bfloat16)
    h1 = jnp.maximum(jnp.dot(xb, w1b, preferred_element_type=jnp.float32), 0.0)
    h2 = jnp.maximum(
        jnp.dot(h1.astype(jnp.bfloat16), w2b, preferred_element_type=jnp.float32), 0.0
    )
    logits = jnp.dot(h2.astype(jnp.bfloat16), w3b, preferred_element_type=jnp.float32)
    return jax.nn.log_softmax(logits, axis=1)


if __name__ == "__main__":
    key = jax.random.PRNGKey(0)
    kx, kp = jax.random.split(key)

    # Small-but-tileable batch: tb resolves to 32 -> 8 pipelined grid steps.
    B = 256
    x = jax.random.normal(kx, (B, IN_FEATURES), dtype=jnp.float32)
    w1_t, w2_t, w3_t = init_params(kp)
    w1p, w2p, w3p = pad_params(w1_t, w2_t, w3_t)   # one-time pad/cast, hoisted

    fwd = jax.jit(mlp_forward)
    out = jax.block_until_ready(fwd(x, w1p, w2p, w3p))

    ref = reference_forward(x, w1_t, w2_t, w3_t)
    assert out.shape == (B, NUM_CLASSES)
    assert bool(jnp.all(jnp.isfinite(out))), "non-finite log-probs"
    assert jnp.allclose(out, ref, atol=1e-3, rtol=1e-3), "mismatch vs. JAX reference"

    print("KERNEL_OK")
</pallas_src>

<mosaic_0001>
module attributes {stable_mosaic.version = 11 : i64} {
  func.func @mlp_kernel(%arg0: i32, %arg1: memref<32x784xf32, #tpu.memory_space<vmem>>, %arg2: memref<784x128xbf16, #tpu.memory_space<vmem>>, %arg3: memref<128x128xbf16, #tpu.memory_space<vmem>>, %arg4: memref<128x128xbf16, #tpu.memory_space<vmem>>, %arg5: memref<32x128xf32, #tpu.memory_space<vmem>>) attributes {dimension_semantics = [#tpu.dimension_semantics<parallel>], iteration_bounds = array<i64: 8>, scalar_prefetch = 0 : i64, scratch_operands = 0 : i64, tpu.core_type = #tpu.core_type<tc>, window_params = [{transform_indices = @transform_0, window_bounds = array<i64: 32, 784>}, {pipeline_mode = #tpu.pipeline_mode<synchronous>, transform_indices = @transform_1, window_bounds = array<i64: 784, 128>}, {pipeline_mode = #tpu.pipeline_mode<synchronous>, transform_indices = @transform_2, window_bounds = array<i64: 128, 128>}, {pipeline_mode = #tpu.pipeline_mode<synchronous>, transform_indices = @transform_3, window_bounds = array<i64: 128, 128>}, {transform_indices = @transform_4, window_bounds = array<i64: 32, 128>}]} {
    %c0 = arith.constant 0 : index
    %c0_0 = arith.constant 0 : index
    %0 = vector.load %arg1[%c0, %c0_0] : memref<32x784xf32, #tpu.memory_space<vmem>>, vector<32x784xf32>
    %1 = arith.truncf %0 : vector<32x784xf32> to vector<32x784xbf16>
    %c0_1 = arith.constant 0 : index
    %c0_2 = arith.constant 0 : index
    %2 = vector.load %arg2[%c0_1, %c0_2] : memref<784x128xbf16, #tpu.memory_space<vmem>>, vector<784x128xbf16>
    %cst = arith.constant dense<0.000000e+00> : vector<32x128xf32>
    %3 = tpu.matmul %1, %2, %cst {dimension_numbers = #tpu.dot_dimension_numbers<[1], [0], [0], [1], [0, 0, 1, 1], [], []>} : vector<32x784xbf16>, vector<784x128xbf16>, vector<32x128xf32> -> vector<32x128xf32>
    %cst_3 = arith.constant 0.000000e+00 : f32
    %4 = vector.broadcast %cst_3 : f32 to vector<32x128xf32>
    %5 = arith.maximumf %3, %4 : vector<32x128xf32>
    %6 = arith.truncf %5 : vector<32x128xf32> to vector<32x128xbf16>
    %c0_4 = arith.constant 0 : index
    %c0_5 = arith.constant 0 : index
    %7 = vector.load %arg3[%c0_4, %c0_5] : memref<128x128xbf16, #tpu.memory_space<vmem>>, vector<128x128xbf16>
    %cst_6 = arith.constant dense<0.000000e+00> : vector<32x128xf32>
    %8 = tpu.matmul %6, %7, %cst_6 {dimension_numbers = #tpu.dot_dimension_numbers<[1], [0], [0], [1], [0, 0, 1, 1], [], []>} : vector<32x128xbf16>, vector<128x128xbf16>, vector<32x128xf32> -> vector<32x128xf32>
    %cst_7 = arith.constant 0.000000e+00 : f32
    %9 = vector.broadcast %cst_7 : f32 to vector<32x128xf32>
    %10 = arith.maximumf %8, %9 : vector<32x128xf32>
    %11 = arith.truncf %10 : vector<32x128xf32> to vector<32x128xbf16>
    %c0_8 = arith.constant 0 : index
    %c0_9 = arith.constant 0 : index
    %12 = vector.load %arg4[%c0_8, %c0_9] : memref<128x128xbf16, #tpu.memory_space<vmem>>, vector<128x128xbf16>
    %cst_10 = arith.constant dense<0.000000e+00> : vector<32x128xf32>
    %13 = tpu.matmul %11, %12, %cst_10 {dimension_numbers = #tpu.dot_dimension_numbers<[1], [0], [0], [1], [0, 0, 1, 1], [], []>} : vector<32x128xbf16>, vector<128x128xbf16>, vector<32x128xf32> -> vector<32x128xf32>
    %14 = tpu.iota {dimensions = array<i32: 1>} : vector<32x128xi32>
    %c10_i32 = arith.constant 10 : i32
    %15 = vector.broadcast %c10_i32 : i32 to vector<32x128xi32>
    %16 = arith.cmpi slt, %14, %15 : vector<32x128xi32>
    %cst_11 = arith.constant 0xFF800000 : f32
    %17 = vector.broadcast %cst_11 : f32 to vector<32x128xf32>
    %18 = arith.select %16, %13, %17 : vector<32x128xi1>, vector<32x128xf32>
    %cst_12 = arith.constant dense<0xFF800000> : vector<32xf32>
    %19 = vector.multi_reduction <maximumf>, %18, %cst_12 [1] : vector<32x128xf32> to vector<32xf32>
    %20 = vector.shape_cast %19 : vector<32xf32> to vector<32x1xf32>
    %21 = vector.broadcast %20 : vector<32x1xf32> to vector<32x128xf32>
    %22 = arith.subf %18, %21 : vector<32x128xf32>
    %23 = math.exp %22 : vector<32x128xf32>
    %cst_13 = arith.constant dense<0.000000e+00> : vector<32xf32>
    %24 = vector.multi_reduction <add>, %23, %cst_13 [1] : vector<32x128xf32> to vector<32xf32>
    %25 = vector.shape_cast %24 : vector<32xf32> to vector<32x1xf32>
    %26 = math.log %25 : vector<32x1xf32>
    %27 = vector.broadcast %26 : vector<32x1xf32> to vector<32x128xf32>
    %28 = arith.subf %22, %27 : vector<32x128xf32>
    %c0_14 = arith.constant 0 : index
    %c0_15 = arith.constant 0 : index
    %29 = vector.load %arg5[%c0_14, %c0_15] : memref<32x128xf32, #tpu.memory_space<vmem>>, vector<32x128xf32>
    tpu.vector_store %arg5[%c0_14, %c0_15], %28 {strides = array<i32>} : memref<32x128xf32, #tpu.memory_space<vmem>>, vector<32x128xf32>,
    return
  }
  func.func @transform_0(%arg0: i32) -> (i32, i32) {
    %c0_i32 = arith.constant 0 : i32
    %c0_i32_0 = arith.constant 0 : i32
    return %arg0, %c0_i32 : i32, i32
  }
  func.func @transform_1(%arg0: i32) -> (i32, i32) {
    %c0_i32 = arith.constant 0 : i32
    %c0_i32_0 = arith.constant 0 : i32
    %c0_i32_1 = arith.constant 0 : i32
    return %c0_i32, %c0_i32_0 : i32, i32
  }
  func.func @transform_2(%arg0: i32) -> (i32, i32) {
    %c0_i32 = arith.constant 0 : i32
    %c0_i32_0 = arith.constant 0 : i32
    %c0_i32_1 = arith.constant 0 : i32
    return %c0_i32, %c0_i32_0 : i32, i32
  }
  func.func @transform_3(%arg0: i32) -> (i32, i32) {
    %c0_i32 = arith.constant 0 : i32
    %c0_i32_0 = arith.constant 0 : i32
    %c0_i32_1 = arith.constant 0 : i32
    return %c0_i32, %c0_i32_0 : i32, i32
  }
  func.func @transform_4(%arg0: i32) -> (i32, i32) {
    %c0_i32 = arith.constant 0 : i32
    %c0_i32_0 = arith.constant 0 : i32
    return %arg0, %c0_i32 : i32, i32
  }
}

</mosaic_0001>

<bundles_post_ra>
// kernel: mlp_forward.1
= control target key start
LH: loop header
LB: loop body
LE: loop exit
PB: predicated region body
PF: predicated region fallthrough
CT: control target
= control target key end

     0   :  { %s1541_s15 = smov 0   ;;  %s1789_s0 = inlined_call_operand.vmem [shape: f32[256,784], index: 0, kind: input, shape index: {}]   ;;  %s1790_s1 = inlined_call_operand.vmem [shape: bf16[784,128], index: 1, kind: input, shape index: {}]   ;;  %s1791_s2 = inlined_call_operand.vmem [shape: bf16[128,128], index: 2, kind: input, shape index: {}]   ;;  %s1792_s3 = inlined_call_operand.vmem [shape: bf16[128,128], index: 3, kind: input, shape index: {}]   ;;  %s1793_s4 = inlined_call_operand.vmem [shape: f32[256,128], index: 4, kind: output, shape index: {}]  }
   0x1 LB: > { %s1187_s16 = sadd.s32 4294967295, %s1514_s15   ;;  %p1191_p0 = scmp.ge.s32.totalorder %s1514_s15, 1  ;;  %s1514_s15 = sphi %s1541_s15, %s14_s15  }
   0x2   : > { %p164_p1 = scmp.lt.s32.totalorder %s1514_s15, 9 }
   0x4   : > { %p165_p2 = pnand %p1191_p0, %p164_p1 }
   0x5   : > { %v1427_v0 = vld [vmem:[%s1790_s1 + $0x40] sm:$0xff] (!%p165_p2)   ;;  %v1431_v4 = vld [vmem:[%s1790_s1 + $0x48] sm:$0xff] (!%p165_p2)   ;;  %v1435_v8 = vld [vmem:[%s1790_s1 + $0x50] sm:$0xff] (!%p165_p2)   ;;  %s1192_s23 = sshll.u32 (!%p165_p2), %s1187_s16, 2  ;;  %vm639_vm0 = vcmask (!%p165_p2), 130048  }
   0x6   : > { %168 = sbr.rel (%p165_p2) target bundleno = 1061 (0x425), region = 36  ;;  %v1428_v1 = vld [vmem:[%s1790_s1 + $0xc0] sm:$0xff] (!%p165_p2)   ;;  %1265 = vmatprep.subr.bf16.mxu0 (!%p165_p2), %v1427_v0  ;;  %v1432_v5 = vld [vmem:[%s1790_s1 + $0xc8] sm:$0xff] (!%p165_p2)   ;;  %v1436_v9 = vld [vmem:[%s1790_s1 + $0xd0] sm:$0xff] (!%p165_p2)   ;;  %p192_p3 = scmp.lt.s32.totalorder (!%p165_p2), %s1192_s23, 31 }
   0x7   : > { %v1429_v2 = vld [vmem:[%s1790_s1] sm:$0xff] (!%p165_p2)   ;;  %1293 = vmatprep.subr.bf16.mxu1 (!%p165_p2), %v1428_v1  ;;  %v1433_v6 = vld [vmem:[%s1790_s1 + $0x8] sm:$0xff] (!%p165_p2)   ;;  %v1437_v10 = vld [vmem:[%s1790_s1 + $0x10] sm:$0xff] (!%p165_p2)  }
   0x8   : > { %v1430_v3 = vld [vmem:[%s1790_s1 + $0x80] sm:$0xff] (!%p165_p2)   ;;  %1266 = vmatpush3.bf16.msra.mxu0 (!%p165_p2), %v1429_v2  ;;  %v1434_v7 = vld [vmem:[%s1790_s1 + $0x88] sm:$0xff] (!%p165_p2)   ;;  %v1438_v11 = vld [vmem:[%s1790_s1 + $0x90] sm:$0xff] (!%p165_p2)  }
   0x9   : > { %1294 = vmatpush3.bf16.msra.mxu1 (!%p165_p2), %v1430_v3  ;;  %1267 = vmatprep.subr.bf16.mxu0 (!%p165_p2), %v1431_v4  ;;  %v1439_v12 = vld [vmem:[%s1790_s1 + $0x58] sm:$0xff] (!%p165_p2)   ;;  %v1443_v16 = vld [vmem:[%s1790_s1 + $0x60] sm:$0xff] (!%p165_p2)   ;;  %v1447_v20 = vld [vmem:[%s1790_s1 + $0x68] sm:$0xff] (!%p165_p2)  }
   0xa   : > { %1295 = vmatprep.subr.bf16.mxu1 (!%p165_p2), %v1432_v5  ;;  %v1440_v13 = vld [vmem:[%s1790_s1 + $0xd8] sm:$0xff] (!%p165_p2)   ;;  %v1444_v17 = vld [vmem:[%s1790_s1 + $0xe0] sm:$0xff] (!%p165_p2)   ;;  %v1448_v21 = vld [vmem:[%s1790_s1 + $0xe8] sm:$0xff] (!%p165_p2)  }
   0xb   : > { %v1441_v14 = vld [vmem:[%s1790_s1 + $0x18] sm:$0xff] (!%p165_p2)   ;;  %v1445_v18 = vld [vmem:[%s1790_s1 + $0x20] sm:$0xff] (!%p165_p2)   ;;  %v1449_v22 = vld [vmem:[%s1790_s1 + $0x28] sm:$0xff] (!%p165_p2)  }
   0xc   : > { %1268 = vmatpush3.bf16.msra.mxu0 (!%p165_p2), %v1433_v6  ;;  %v1442_v15 = vld [vmem:[%s1790_s1 + $0x98] sm:$0xff] (!%p165_p2)   ;;  %v1446_v19 = vld [vmem:[%s1790_s1 + $0xa0] sm:$0xff] (!%p165_p2)   ;;  %v1450_v23 = vld [vmem:[%s1790_s1 + $0xa8] sm:$0xff] (!%p165_p2)  }
   0xd   : > { %1296 = vmatpush3.bf16.msra.mxu1 %v1434_v7  ;;  %1269 = vmatprep.subr.bf16.mxu0 %v1435_v8  ;;  %s1795_s23 = smov (!%p192_p3, %s1192_s23), 31  ;;  %v1451_v24 = vld [vmem:[%s1790_s1 + $0x70] sm:$0xff]   ;;  %v1455_v28 = vld [vmem:[%s1790_s1 + $0x78] sm:$0xff]   ;;  %v1459_v44 = vld [vmem:[%s1790_s1 + $0x140] sm:$0xff]  }
   0xe   : > { %1297 = vmatprep.subr.bf16.mxu1 %v1436_v9  ;;  %v1452_v25 = vld [vmem:[%s1790_s1 + $0xf0] sm:$0xff]   ;;  %s1418_s21 = smul.u32 56, %s1795_s23  ;;  %v1456_v29 = vld [vmem:[%s1790_s1 + $0xf8] sm:$0xff]   ;;  %v1460_v45 = vld [vmem:[%s1790_s1 + $0x100] sm:$0xff]   ;;  %s1195_s16 = sshll.u32 %s1795_s23, 3 }
   0xf   : > { %v1453_v26 = vld [vmem:[%s1790_s1 + $0x30] sm:$0xff]   ;;  %v1457_v30 = vld [vmem:[%s1790_s1 + $0x38] sm:$0xff]   ;;  %v1461_v46 = vld [vmem:[%s1790_s1 + $0x148] sm:$0xff]   ;;  %s202_s9 = scalar_lea.vmem %s1793_s4, %s1195_s16 }
  0x10   : > { %1270 = vmatpush3.bf16.msra.mxu0 %v1437_v10  ;;  %v1454_v27 = vld [vmem:[%s1790_s1 + $0xb0] sm:$0xff]   ;;  %s1647_s6 = scalar_lea.vmem %s1789_s0, %s1418_s21  ;;  %v1458_v31 = vld [vmem:[%s1790_s1 + $0xb8] sm:$0xff]   ;;  %v1462_v47 = vld [vmem:[%s1790_s1 + $0x108] sm:$0xff]  }
  0x11   : > { %1298 = vmatpush3.bf16.msra.mxu1 %v1438_v11  ;;  %1271 = vmatprep.subr.bf16.mxu0 %v1439_v12  ;;  %v206_v32 = vld [vmem:[%s1647_s6 + $0x8] sm:$0xff]  ;;  %v213_v33 = vld [vmem:[%s1647_s6 + $0x40] sm:$0xff]  ;;  %v208_v34 = vld [vmem:[%s1647_s6 + $0x18] sm:$0xff] }
  0x12   : > { %1299 = vmatprep.subr.bf16.mxu1 %v1440_v13  ;;  %v234_v35 = vpack.c.bf16 %v213_v33, %v206_v32  ;;  %v215_v36 = vld [vmem:[%s1647_s6 + $0x50] sm:$0xff]  ;;  %v205_v37 = vld [vmem:[%s1647_s6] sm:$0xff]  ;;  %v212_v38 = vld [vmem:[%s1647_s6 + $0x38] sm:$0xff] }
  0x13   : > { %v236_v39 = vpack.c.bf16 %v215_v36, %v208_v34  ;;  %v233_v40 = vpack.c.bf16 %v212_v38, %v205_v37  ;;  %v207_v41 = vld [vmem:[%s1647_s6 + $0x10] sm:$0xff]  ;;  %v214_v42 = vld [vmem:[%s1647_s6 + $0x48] sm:$0xff]  ;;  %v1465_v50 = vld [vmem:[%s1790_s1 + $0x158] sm:$0xff]  }
  0x14   : > { %1272 = vmatpush3.bf16.msra.mxu0 %v1441_v14  ;;  %678 = vmatprep.mubr.bf16.mxu0 %v234_v35  ;;  %v235_v43 = vpack.c.bf16 %v214_v42, %v207_v41  ;;  %v1463_v48 = vld [vmem:[%s1790_s1 + $0x150] sm:$0xff]   ;;  %v1466_v51 = vld [vmem:[%s1790_s1 + $0x118] sm:$0xff]   ;;  %v222_v54 = vld [vmem:[%s1647_s6 + $0x88] sm:$0xff] }
  0x15   : > { %1300 = vmatpush3.bf16.msra.mxu1 %v1442_v15  ;;  %1273 = vmatprep.subr.bf16.mxu0 %v1443_v16  ;;  %v1464_v49 = vld [vmem:[%s1790_s1 + $0x110] sm:$0xff]   ;;  %v220_v52 = vld [vmem:[%s1647_s6 + $0x78] sm:$0xff]  ;;  %v229_v55 = vld [vmem:[%s1647_s6 + $0xc0] sm:$0xff] }
  0x16   : > { %1301 = vmatprep.subr.bf16.mxu1 %v1444_v17  ;;  %727 = vmatprep.mubr.bf16.mxu1 %v236_v39  ;;  %v227_v53 = vld [vmem:[%s1647_s6 + $0xb0] sm:$0xff]  ;;  %v1467_v56 = vld [vmem:[%s1790_s1 + $0x160] sm:$0xff]   ;;  %v243_v58 = vpack.c.bf16 %v229_v55, %v222_v54  ;;  %v226_v60 = vld [vmem:[%s1647_s6 + $0xa8] sm:$0xff] }
  0x17   : > { %v241_v57 = vpack.c.bf16 %v227_v53, %v220_v52  ;;  %v219_v59 = vld [vmem:[%s1647_s6 + $0x70] sm:$0xff]  ;;  %v221_v61 = vld [vmem:[%s1647_s6 + $0x80] sm:$0xff]  ;;  %v228_v63 = vld [vmem:[%s1647_s6 + $0xb8] sm:$0xff] }
  0x18   : > { %1274 = vmatpush3.bf16.msra.mxu0 %v1445_v18  ;;  %v240_v62 = vpack.c.bf16 %v226_v60, %v219_v59  ;;  %v242_v0 = vpack.c.bf16 %v228_v63, %v221_v61  ;;  %v1468_v1 = vld [vmem:[%s1790_s1 + $0x120] sm:$0xff]   ;;  %v1469_v2 = vld [vmem:[%s1790_s1 + $0x168] sm:$0xff]   ;;  %v1471_v7 = vld [vmem:[%s1790_s1 + $0x170] sm:$0xff]  }
  0x19   : > { %1302 = vmatpush3.bf16.msra.mxu1 %v1446_v19  ;;  %1275 = vmatprep.subr.bf16.mxu0 %v1447_v20  ;;  %v1473_v3 = vld [vmem:[%s1790_s1 + $0x180] sm:$0xff]   ;;  %v1470_v4 = vld [vmem:[%s1790_s1 + $0x128] sm:$0xff]   ;;  %v211_v9 = vld [vmem:[%s1647_s6 + $0x30] sm:$0xff] }
  0x1a   : > { %1303 = vmatprep.subr.bf16.mxu1 %v1448_v21  ;;  %v210_v5 = vld [vmem:[%s1647_s6 + $0x28] sm:$0xff]  ;;  %v217_v6 = vld [vmem:[%s1647_s6 + $0x60] sm:$0xff]  ;;  %v232_v12 = vld [vmem:[%s1647_s6 + $0xd8] sm:$0xff] }
  0x1b   : > { %v238_v8 = vpack.c.bf16 %v217_v6, %v210_v5  ;;  %v218_v10 = vld [vmem:[%s1647_s6 + $0x68] sm:$0xff]  ;;  %v225_v11 = vld [vmem:[%s1647_s6 + $0xa0] sm:$0xff]  ;;  %v1472_v13 = vld [vmem:[%s1790_s1 + $0x130] sm:$0xff]  }
  0x1c   : > { %1276 = vmatpush3.bf16.msra.mxu0 %v1449_v22  ;;  %v239_v14 = vpack.c.bf16 %v218_v10, %v211_v9  ;;  %v246_v15 = vpack.c.bf16 %v232_v12, %v225_v11  ;;  %v1474_v16 = vld [vmem:[%s1790_s1 + $0x178] sm:$0xff]   ;;  %v209_v18 = vld [vmem:[%s1647_s6 + $0x20] sm:$0xff]  ;;  %v231_v21 = vld [vmem:[%s1647_s6 + $0xd0] sm:$0xff] }
  0x1d   : > { %1304 = vmatpush3.bf16.msra.mxu1 %v1450_v23  ;;  %1277 = vmatprep.subr.bf16.mxu0 %v1451_v24  ;;  %v1475_v17 = vld [vmem:[%s1790_s1 + $0x138] sm:$0xff]   ;;  %v223_v24 = vld [vmem:[%s1647_s6 + $0x90] sm:$0xff]  ;;  %v1481_v32 = vld [vmem:[%s1791_s2 + $0x28] sm:$0xff]  }
  0x1e   : > { %1305 = vmatprep.subr.bf16.mxu1 %v1452_v25  ;;  %v216_v19 = vld [vmem:[%s1647_s6 + $0x58] sm:$0xff]  ;;  %v230_v25 = vld [vmem:[%s1647_s6 + $0xc8] sm:$0xff]  ;;  %v1482_v33 = vld [vmem:[%s1791_s2 + $0x30] sm:$0xff]  }
  0x1f   : > { %v224_v20 = vld [vmem:[%s1647_s6 + $0x98] sm:$0xff]  ;;  %v237_v22 = vpack.c.bf16 %v216_v19, %v209_v18  ;;  %v1484_v35 = vld [vmem:[%s1792_s3] sm:$0xff]   ;;  %v1485_v36 = vld [vmem:[%s1792_s3 + $0x8] sm:$0xff]  }
  0x20   : > { %1278 = vmatpush3.bf16.msra.mxu0 %v1453_v26  ;;  %v245_v23 = vpack.c.bf16 %v231_v21, %v224_v20  ;;  %v244_v26 = vpack.c.bf16 %v230_v25, %v223_v24  ;;  %v1483_v34 = vld [vmem:[%s1791_s2 + $0x38] sm:$0xff]   ;;  %v1486_v37 = vld [vmem:[%s1792_s3 + $0x10] sm:$0xff]   ;;  %v1488_v39 = vld [vmem:[%s1792_s3 + $0x20] sm:$0xff]  }
  0x21   : > { %1306 = vmatpush3.bf16.msra.mxu1 %v1454_v27  ;;  %1279 = vmatprep.subr.bf16.mxu0 %v1455_v28  ;;  %v1476_v27 = vld [vmem:[%s1791_s2] sm:$0xff]   ;;  %v1477_v28 = vld [vmem:[%s1791_s2 + $0x8] sm:$0xff]   ;;  %v1487_v38 = vld [vmem:[%s1792_s3 + $0x18] sm:$0xff]  }
  0x22   : > { %1307 = vmatprep.subr.bf16.mxu1 %v1456_v29  ;;  %v1478_v29 = vld [vmem:[%s1791_s2 + $0x10] sm:$0xff]  }
  0x24   : > { %1280 = vmatpush3.bf16.msra.mxu0 %v1457_v30  ;;  %v1479_v30 = vld [vmem:[%s1791_s2 + $0x18] sm:$0xff]  }
  0x25   : > { %1308 = vmatpush3.bf16.msra.mxu1 %v1458_v31  ;;  %1321 = vmatprep.subr.bf16.mxu0 %v1459_v44  ;;  %v1480_v31 = vld [vmem:[%s1791_s2 + $0x20] sm:$0xff]  }
  0x26   : > { %1372 = vmatprep.subr.bf16.mxu1 %v1473_v3 }
  0x27   : > { %679 = vmatmul.mubr.bf16.vlgmr.msra.gmra.mrb[0].mxu0 %v233_v40  ;;  %v1489_v40 = vld [vmem:[%s1792_s3 + $0x28] sm:$0xff]  }
  0x28   : > { %728 = vmatmul.mubr.bf16.vlgmr.msra.gmra.mrb[0].mxu1 %v235_v43  ;;  %1322 = vmatpush3.bf16.msra.mxu0 %v1460_v45 }
  0x29   : > { %1323 = vmatprep.subr.bf16.mxu0 %v1461_v46  ;;  %686 = vmatprep.mubr.bf16.mxu0 %v241_v57 }
  0x2a   : > { %735 = vmatprep.mubr.bf16.mxu1 %v243_v58  ;;  %1373 = vmatpush3.bf16.msra.mxu1 %v1473_v3 }
  0x2b   : > { %1378 = vmatprep.subr.bf16.mxu1 %v1476_v27 }
  0x2c   : > { %1324 = vmatpush3.bf16.msra.mxu0 %v1462_v47 }
  0x2d   : > { %1325 = vmatprep.subr.bf16.mxu0 %v1463_v48 }
  0x2f   : > { %687 = vmatmul.mubr.bf16.gmra.mrb[4].mxu0 %v240_v62 }
  0x30   : > { %1326 = vmatpush3.bf16.msra.mxu0 %v1464_v49  ;;  %736 = vmatmul.mubr.bf16.gmra.mrb[4].mxu1 %v242_v0 }
  0x31   : > { %1327 = vmatprep.subr.bf16.mxu0 %v1465_v50  ;;  %776 = vmatprep.mubr.bf16.mxu0 %v238_v8 }
  0x32   : > { %1374 = vmatprep.mubr.msk.bf16.mxu1 %vm639_vm0, %v239_v14 }
  0x34   : > { %1328 = vmatpush3.bf16.msra.mxu0 %v1466_v51 }
  0x35   : > { %1329 = vmatprep.subr.bf16.mxu0 %v1467_v56 }
  0x38   : > { %1330 = vmatpush3.bf16.msra.mxu0 %v1468_v1  ;;  %1375 = vmatmul.mubr.msk.bf16.vlgmr.msra.gmra.mrb[8].mxu1 %vm639_vm0, %v246_v15 }
  0x39   : > { %1331 = vmatprep.subr.bf16.mxu0 %v1469_v2  ;;  %1379 = vmatpush3.bf16.msra.mxu1 %v1476_v27 }
  0x3a   : > { %1380 = vmatprep.subr.bf16.mxu1 %v1477_v28 }
  0x3c   : > { %1332 = vmatpush3.bf16.msra.mxu0 %v1470_v4 }
  0x3d   : > { %1333 = vmatprep.subr.bf16.mxu0 %v1471_v7  ;;  %1381 = vmatpush3.bf16.msra.mxu1 %v1477_v28 }
  0x3e   : > { %1382 = vmatprep.subr.bf16.mxu1 %v1478_v29 }
  0x40   : > { %1334 = vmatpush3.bf16.msra.mxu0 %v1472_v13 }
  0x41   : > { %1335 = vmatprep.subr.bf16.mxu0 %v1474_v16  ;;  %1383 = vmatpush3.bf16.msra.mxu1 %v1478_v29 }
  0x42   : > { %1384 = vmatprep.subr.bf16.mxu1 %v1479_v30 }
  0x44   : > { %1336 = vmatpush3.bf16.msra.mxu0 %v1475_v17 }
  0x45   : > { %1385 = vmatpush3.bf16.msra.mxu1 %v1479_v30  ;;  %1398 = vmatprep.subr.bf16.mxu0 %v1484_v35 }
  0x46   : > { %1386 = vmatprep.subr.bf16.mxu1 %v1480_v31 }
  0x47   : > { %777 = vmatmul.mubr.bf16.vlgmr.msra.gmra.mrb[8].mxu0 %v237_v22 }
  0x48   : > { %784 = vmatprep.mubr.bf16.mxu0 %v245_v23  ;;  %1399 = vmatpush3.bf16.msra.mxu0 %v1484_v35  ;;  %v1490_v35 = vld [vmem:[%s1792_s3 + $0x30] sm:$0xff]  }
  0x49   : > { %1387 = vmatpush3.bf16.msra.mxu1 %v1480_v31  ;;  %1400 = vmatprep.subr.bf16.mxu0 %v1485_v36 }
  0x4a   : > { %1388 = vmatprep.subr.bf16.mxu1 %v1481_v32 }
  0x4c   : > { %1401 = vmatpush3.bf16.msra.mxu0 %v1485_v36  ;;  %v1491_v36 = vld [vmem:[%s1792_s3 + $0x38] sm:$0xff]  }
  0x4d   : > { %1389 = vmatpush3.bf16.msra.mxu1 %v1481_v32  ;;  %1402 = vmatprep.subr.bf16.mxu0 %v1486_v37 }
  0x4e   : > { %1390 = vmatprep.subr.bf16.mxu1 %v1482_v33 }
  0x4f   : > { %785 = vmatmul.mubr.bf16.gmra.mrb[12].mxu0 %v244_v26 }
  0x50   : > { %1403 = vmatpush3.bf16.msra.mxu0 %v1486_v37 }
  0x51   : > { %1391 = vmatpush3.bf16.msra.mxu1 %v1482_v33  ;;  %1404 = vmatprep.subr.bf16.mxu0 %v1487_v38 }
  0x52   : > { %1392 = vmatprep.subr.bf16.mxu1 %v1483_v34 }
  0x54   : > { %1405 = vmatpush3.bf16.msra.mxu0 %v1487_v38 }
  0x55   : > { %1393 = vmatpush3.bf16.msra.mxu1 %v1483_v34  ;;  %1406 = vmatprep.subr.bf16.mxu0 %v1488_v39 }
  0x58   : > { %1407 = vmatpush3.bf16.msra.mxu0 %v1488_v39 }
  0x59   : > { %1408 = vmatprep.subr.bf16.mxu0 %v1489_v40 }
  0x5c   : > { %1409 = vmatpush3.bf16.msra.mxu0 %v1489_v40 }
  0x5d   : > { %1410 = vmatprep.subr.bf16.mxu0 %v1490_v35 }
  0x60   : > { %1411 = vmatpush3.bf16.msra.mxu0 %v1490_v35 }
  0x61   : > { %1412 = vmatprep.subr.bf16.mxu0 %v1491_v36 }
  0x64   : > { %1413 = vmatpush3.bf16.msra.mxu0 %v1491_v36 }
  0xfa   : > { %v1281_v41 = vpop.f32.mrb[0].mxu0 }
  0xfb   : > { %v1309_v42 = vpop.f32.mrb[0].mxu1  ;;  %v1282_v43 = vpop.f32.mrb[1].mxu0 }
  0xfc   : > { %v1283_v44 = vadd.f32 %v1282_v43, %v1281_v41  ;;  %v1310_v45 = vpop.f32.mrb[1].mxu1  ;;  %v1284_v46 = vpop.f32.mrb[2].mxu0 }
  0xfd   : > { %v1311_v47 = vadd.f32 %v1310_v45, %v1309_v42  ;;  %v1312_v48 = vpop.f32.mrb[2].mxu1  ;;  %v1285_v49 = vpop.f32.mrb[3].mxu0 }
  0xfe   : > { %v1286_v50 = vadd.f32 %v1285_v49, %v1284_v46  ;;  %v1313_v51 = vpop.f32.mrb[3].mxu1 }
  0xff   : > { %v730_v52 = vadd.f32 %v1311_v47, %v1283_v44  ;;  %v1314_v53 = vadd.f32 %v1313_v51, %v1312_v48  ;;  %v1080_v47 = vlaneseq }
 0x101   : > { %v733_v54 = vadd.f32 %v1314_v53, %v1286_v50  ;;  %v1081_v48 = vand.u32 127, %v1080_v47 }
 0x102   : > { %v1287_v55 = vpop.f32.mrb[4].mxu0 }
 0x103   : > { %v1315_v56 = vpop.f32.mrb[4].mxu1  ;;  %v1288_v57 = vpop.f32.mrb[5].mxu0  ;;  %vm1082_vm1 = vcmp.lt.s32.totalorder %v1081_v48, 10 }
 0x104   : > { %v1289_v58 = vadd.f32 %v1288_v57, %v1287_v55  ;;  %v1316_v59 = vpop.f32.mrb[5].mxu1  ;;  %v1290_v60 = vpop.f32.mrb[6].mxu0 }
 0x105   : > { %v1317_v61 = vadd.f32 %v1316_v59, %v1315_v56  ;;  %v1318_v62 = vpop.f32.mrb[6].mxu1  ;;  %v1291_v63 = vpop.f32.mrb[7].mxu0 }
 0x106   : > { %v1292_v0 = vadd.f32 %v1291_v63, %v1290_v60  ;;  %v1319_v1 = vpop.f32.mrb[7].mxu1 }
 0x107   : > { %v738_v2 = vadd.f32 %v1317_v61, %v1289_v58  ;;  %v1320_v3 = vadd.f32 %v1319_v1, %v1318_v62 }
 0x109   : > { %v741_v4 = vadd.f32 %v1320_v3, %v1292_v0 }
 0x10b   : > { %v1376_v5 = vpop.f32.mrb[8].mxu1 }
 0x10c   : > { %v827_v6 = vpop.f32.mrb[9].mxu1 }
 0x10d   : > { %v1377_v7 = vpop.f32.mrb[10].mxu1 }
 0x10e   : > { %v830_v8 = vpop.f32.mrb[11].mxu1 }
 0x11a   : > { %v1337_v9 = vpop.f32.mrb[8].mxu0 }
 0x11b   : > { %v1338_v10 = vpop.f32.mrb[9].mxu0 }
 0x11c   : > { %v1339_v11 = vadd.f32 %v1338_v10, %v1337_v9  ;;  %v1340_v12 = vpop.f32.mrb[10].mxu0 }
 0x11d   : > { %v1341_v13 = vpop.f32.mrb[11].mxu0 }
 0x11e   : > { %v1342_v14 = vadd.f32 %v1341_v13, %v1340_v12  ;;  %v779_v15 = vadd.f32 %v1339_v11, %v730_v52 }
 0x120   : > { %v828_v16 = vadd.f32 %v827_v6, %v779_v15  ;;  %v782_v17 = vadd.f32 %v1342_v14, %v733_v54 }
 0x122   : > { %v831_v18 = vadd.f32 %v830_v8, %v782_v17  ;;  %v1343_v19 = vpop.f32.mrb[12].mxu0  ;;  %v842_v21 = vmax.f32 %v828_v16, 0.0 }
 0x123   : > { %v1344_v20 = vpop.f32.mrb[13].mxu0 }
 0x124   : > { %v843_v22 = vmax.f32 %v831_v18, 0.0  ;;  %v1345_v23 = vadd.f32 %v1344_v20, %v1343_v19  ;;  %v1346_v24 = vpop.f32.mrb[14].mxu0 }
 0x125   : > { %v1347_v25 = vpop.f32.mrb[15].mxu0 }
 0x126   : > { %v846_v26 = vpack.c.bf16 %v843_v22, %v842_v21  ;;  %v787_v27 = vadd.f32 %v1345_v23, %v738_v2  ;;  %v1348_v28 = vadd.f32 %v1347_v25, %v1346_v24 }
 0x128   : > { %v836_v29 = vadd.f32 %v1376_v5, %v787_v27  ;;  %v790_v30 = vadd.f32 %v1348_v28, %v741_v4  ;;  %1394 = vmatprep.mubr.bf16.mxu1 %v846_v26 }
 0x12a   : > { %v839_v31 = vadd.f32 %v1377_v7, %v790_v30  ;;  %v844_v32 = vmax.f32 %v836_v29, 0.0 }
 0x12c   : > { %v845_v33 = vmax.f32 %v839_v31, 0.0 }
 0x12e   : > { %v847_v34 = vpack.c.bf16 %v845_v33, %v844_v32 }
 0x130   : > { %1395 = vmatmul.mubr.bf16.vlgmr.msra.gmra.mrb[12].mxu1 %v847_v34 }
 0x203   : > { %v1396_v37 = vpop.f32.mrb[12].mxu1 }
 0x204   : > { %v946_v38 = vpop.f32.mrb[13].mxu1  ;;  %v963_v40 = vmax.f32 %v1396_v37, 0.0 }
 0x205   : > { %v1397_v39 = vpop.f32.mrb[14].mxu1  ;;  %v961_v43 = vmax.f32 %v946_v38, 0.0 }
 0x206   : > { %v964_v41 = vmax.f32 %v1397_v39, 0.0  ;;  %v949_v42 = vpop.f32.mrb[15].mxu1 }
 0x207   : > { %v962_v44 = vmax.f32 %v949_v42, 0.0 }
 0x208   : > { %v966_v45 = vpack.c.bf16 %v964_v41, %v963_v40 }
 0x209   : > { %v965_v46 = vpack.c.bf16 %v962_v44, %v961_v43 }
 0x20b   : > { %1414 = vmatprep.mubr.bf16.mxu0 %v965_v46 }
 0x20c   : > { %1415 = vmatmul.mubr.bf16.vlgmr.msra.gmra.mrb[16].mxu0 %v966_v45 }
 0x2df   : > { %v1416_v49 = vpop.f32.mrb[16].mxu0 }
 0x2e0   : > { %v1065_v50 = vpop.f32.mrb[17].mxu0  ;;  %v1085_v51 = vsel %vm1082_vm1, %v1416_v49, -inf }
 0x2e1   : > { %1091 = vmax.xlane.f32.xlu1 %v1085_v51  ;;  %v1417_v52 = vpop.f32.mrb[18].mxu0  ;;  %v1083_v53 = vsel %vm1082_vm1, %v1065_v50, -inf }
 0x2e2   : > { %1087 = vmax.xlane.f32.xlu0 %v1083_v53  ;;  %v1068_v54 = vpop.f32.mrb[19].mxu0  ;;  %v1086_v55 = vsel %vm1082_vm1, %v1417_v52, -inf }
 0x2e3   : > { %v1084_v56 = vsel %vm1082_vm1, %v1068_v54, -inf }
 0x2e5   : > { %1093 = vmax.xlane.f32.xlu1 %v1086_v55 }
 0x2e6   : > { %1089 = vmax.xlane.f32.xlu0 %v1084_v56 }
 0x36e   : > { %v1092_v57 = vpop.xlane.xlu1 %1091 }
 0x36f   : > { %v1097_v58 = vsub.f32 %v1085_v51, %v1092_v57  ;;  %v1088_v59 = vpop.xlane.xlu0 %1087 }
 0x370   : > { %v1095_v60 = vsub.f32 %v1083_v53, %v1088_v59 }
 0x371   : > { %v1103_v63 = vmul.f32 1.442695, %v1097_v58 }
 0x372   : > { %v1099_v61 = vmul.f32 1.442695, %v1095_v60  ;;  %v1094_v62 = vpop.xlane.xlu1 %1093 }
 0x373   : > { %v1090_v0 = vpop.xlane.xlu0 %1089  ;;  %v1098_v1 = vsub.f32 %v1086_v55, %v1094_v62 }
 0x374   : > { %1492 = vpow2.f32 %v1099_v61  ;;  %v1096_v2 = vsub.f32 %v1084_v56, %v1090_v0 }
 0x375   : > { %1494 = vpow2.f32 %v1103_v63  ;;  %v1105_v4 = vmul.f32 1.442695, %v1098_v1 }
 0x376   : > { %v1101_v3 = vmul.f32 1.442695, %v1096_v2 }
 0x378   : > { %1496 = vpow2.f32 %v1101_v3 }
 0x379   : > { %1498 = vpow2.f32 %v1105_v4 }
 0x37e   : > { %v1493_v5 = vpop.eup %1492 }
 0x37f   : > { %1107 = vadd.xlane.f32.xlu0 %v1493_v5  ;;  %v1495_v6 = vpop.eup %1494 }
 0x382   : > { %v1497_v7 = vpop.eup %1496 }
 0x383   : > { %1111 = vadd.xlane.f32.xlu0 %v1495_v6  ;;  %1109 = vadd.xlane.f32.xlu1 %v1497_v7  ;;  %v1499_v8 = vpop.eup %1498 }
 0x387   : > { %1113 = vadd.xlane.f32.xlu1 %v1499_v8 }
 0x40c   : > { %v1108_v9 = vpop.xlane.xlu0 %1107 }
 0x40d   : > { %1500 = vlog2.f32 %v1108_v9 }
 0x410   : > { %v1110_v10 = vpop.xlane.xlu1 %1109  ;;  %v1112_v11 = vpop.xlane.xlu0 %1111 }
 0x411   : > { %1502 = vlog2.f32 %v1110_v10 }
 0x412   : > { %1504 = vlog2.f32 %v1112_v11 }
 0x414   : > { %v1114_v12 = vpop.xlane.xlu1 %1113 }
 0x415   : > { %1506 = vlog2.f32 %v1114_v12 }
 0x417   : > { %v1501_v13 = vpop.eup %1500 }
 0x418   : > { %v1116_v14 = vmul.f32 0.6931472, %v1501_v13 }
 0x41a   : > { %v1123_v15 = vsub.f32 %v1095_v60, %v1116_v14 }
 0x41b   : > { %v1503_v16 = vpop.eup %1502 }
 0x41c   : > { %v1505_v17 = vpop.eup %1504  ;;  %1127 = vst [vmem:[%s202_s9] sm:$0xff] %v1123_v15  ;;  %v1118_v18 = vmul.f32 0.6931472, %v1503_v16 }
 0x41d   : > { %v1120_v19 = vmul.f32 0.6931472, %v1505_v17 }
 0x41e   : > { %v1124_v20 = vsub.f32 %v1096_v2, %v1118_v18 }
 0x41f   : > { %v1507_v21 = vpop.eup %1506  ;;  %v1125_v22 = vsub.f32 %v1097_v58, %v1120_v19 }
 0x420   : > { %1128 = vst [vmem:[%s202_s9 + $0x8] sm:$0xff] %v1124_v20  ;;  %v1122_v23 = vmul.f32 0.6931472, %v1507_v21 }
 0x421   : > { %1129 = vst [vmem:[%s202_s9 + $0x10] sm:$0xff] %v1125_v22 }
 0x422   : > { %v1126_v24 = vsub.f32 %v1098_v1, %v1122_v23 }
 0x424   : > { %1130 = vst [vmem:[%s202_s9 + $0x18] sm:$0xff] %v1126_v24 }
 0x425 PF: > { %s14_s15 = sadd.s32 1, %s1514_s15  }
 0x426   : > { %p11_p4 = scmp.ge.s32.totalorder %s14_s15, 10  }
 0x428   :  { %13 = sbr.rel (!%p11_p4) target bundleno = 1 (0x1), region = 66 }

</bundles_post_ra>
